<compile_context>
chip_gen: v7x
topology: tpu7x:2x2x1
jax: 0.10.0
libtpu: 0.0.40
codegen_flags: <defaults>
</compile_context>

<pallas_src>
import functools

import jax
import jax.numpy as jnp
from jax.experimental import pallas as pl
from jax.experimental.pallas import tpu as pltpu


def _mha_kernel(x_ref, ws_ref, bs_ref, hc_ref, y_ref, att_ref, *, TB, T, C, H):
    x = x_ref[...]                                    # (TB, T, C), f32 or bf16
    # NOTE: if production T is not sublane-aligned (8 for f32, 16 for bf16) this merge incurs a
    # relayout; pad T in the wrapper (with -inf score masking) for such shapes.
    x2 = x.reshape(TB * T, C)

    # --- scores for all heads in ONE small MXU matmul (query/bias/1/temp pre-folded) --------
    s = jnp.dot(x2, ws_ref[...], preferred_element_type=jnp.float32) + bs_ref[...]  # (TB*T, H)
    s = s.reshape(TB, T, H)

    # --- softmax over T, batched over (batch, head) on the VPU; exact denominator ------------
    m = jnp.max(s, axis=1, keepdims=True)             # (TB, 1, H)
    e = jnp.exp(s - m)                                # (TB, T, H)
    a = e / jnp.sum(e, axis=1, keepdims=True)         # (TB, T, H)
    # TODO(synk): nn.Dropout(p) on `att` is identity in eval mode; training-mode dropout
    # (mask + 1/(1-p) scale) is not implemented here.

    att_ref[...] = a                                  # dense (tb, T, H) block, no slab reshape

    # --- weighted value sum: y[b, c] = sum_t a[b, t, c // Dv] * x[b, t, c] --------------------
    # Head->channel expansion as a matmul with a constant 0/1 (H, C) matrix: MXU is idle here
    # and this keeps the layout lane-dense (no broadcast/reshape relayout).
    a_full = jnp.dot(a.reshape(TB * T, H), hc_ref[...],
                     preferred_element_type=jnp.float32)              # (TB*T, C)
    xf = x2.astype(jnp.float32)                       # upcast once for the VPU (v5e: no bf16 VALU)
    y_ref[...] = jnp.sum((a_full * xf).reshape(TB, T, C), axis=1)     # (TB, C)


def _vmem_budget():
    """Returns (per-step VMEM budget for tile sizing, vmem_limit_bytes) by TPU generation."""
    kind = ""
    try:
        kind = jax.devices()[0].device_kind.lower()
    except Exception:
        pass
    if "v5" in kind or "v6" in kind:
        return 64 << 20, 100 << 20   # 128 MiB physical VMEM: raise the 16/32 MiB scoped default
    if "v7" in kind:
        return 36 << 20, 48 << 20    # 64 MiB physical on v7x: stay well inside it
    return 12 << 20, None            # unknown generation: stay inside the default scoped limit


def multi_head_attention(x, wk, bk, q, *, n_head, d_k, tb=None, compute_dtype=None):
    """x: (B, T, C). Returns (y (B, C) f32, att (B, n_head, 1, T) f32).

    tb:            batch tile size (must divide B); None -> generation-aware auto choice.
    compute_dtype: dtype for x / folded weight fed to the kernel (e.g. jnp.bfloat16 to halve
                   the dominant DMA traffic). Accumulation stays f32. None -> keep x.dtype.
    """
    B, T, C = x.shape
    H, Dk = n_head, d_k
    Dv = C // H
    inv_temp = 1.0 / float(d_k) ** 0.5
    hp = jax.lax.Precision.HIGHEST

    # Fold query, bias and 1/temperature into the key projection (all linear, exact):
    #   s[b,t,h] = inv_temp * (x[b,t,:] @ wk[:, h*Dk:(h+1)*Dk] + bk[h*Dk:(h+1)*Dk]) . q[h,:]
    #            = x[b,t,:] @ ws[:, h] + bs[h]
    qf = q.astype(jnp.float32)
    ws = jnp.einsum('chd,hd->ch', wk.astype(jnp.float32).reshape(C, H, Dk), qf,
                    precision=hp) * inv_temp                                       # (C, H)
    bs = (jnp.sum(bk.astype(jnp.float32).reshape(H, Dk) * qf, axis=-1)
          * inv_temp).reshape(1, H)                                                # (1, H)

    # Constant 0/1 head->channel expansion matrix used to apply att to V on the MXU.
    head_to_chan = (jnp.arange(C)[None, :] // Dv == jnp.arange(H)[:, None]).astype(jnp.float32)

    if compute_dtype is not None:
        x = x.astype(compute_dtype)
        ws = ws.astype(compute_dtype)

    budget, vmem_limit = _vmem_budget()
    xb = x.dtype.itemsize
    # Per-batch-element VMEM bytes: double-buffered x block, f32 temporaries (x upcast, a_full,
    # product), score/softmax temps and the double-buffered y/att output blocks.
    per_b = T * C * (2 * xb + 4 * 4) + T * H * 4 * 8 + C * 4 * 2
    # Grid-invariant blocks (double-buffered): ws, bs, head_to_chan.
    fixed = 2 * (C * H * ws.dtype.itemsize + H * 4 + H * C * 4)

    if tb is None:
        cap = max(1, (budget - fixed) // per_b)
        cap = min(cap, B if B == 1 else B // 2)   # keep >=2 grid steps so both v7x TCs get work
        divisors = [d for d in range(1, cap + 1) if B % d == 0]
        aligned = [d for d in divisors if d % 8 == 0 or d == B]   # sublane-aligned (tb, C) block
        tb = max(aligned) if aligned else max(divisors)
    assert B % tb == 0, "batch tile must divide B"
    grid = (B // tb,)

    kernel = functools.partial(_mha_kernel, TB=tb, T=T, C=C, H=H)

    y, att_bth = pl.pallas_call(
        kernel,
        grid=grid,
        out_shape=(
            jax.ShapeDtypeStruct((B, C), jnp.float32),
            jax.ShapeDtypeStruct((B, T, H), jnp.float32),
        ),
        in_specs=[
            # batch-tiled activations
            pl.BlockSpec((tb, T, C), lambda i: (i, 0, 0)),
            # grid-invariant folded weight / bias / expansion matrix: DMA'd once, VMEM-resident
            pl.BlockSpec((C, H), lambda i: (0, 0)),
            pl.BlockSpec((1, H), lambda i: (0, 0)),
            pl.BlockSpec((H, C), lambda i: (0, 0)),
        ],
        out_specs=(
            pl.BlockSpec((tb, C), lambda i: (i, 0)),
            pl.BlockSpec((tb, T, H), lambda i: (i, 0, 0)),
        ),
        compiler_params=pltpu.CompilerParams(
            dimension_semantics=("parallel",),
            vmem_limit_bytes=vmem_limit,
        ),
    )(x, ws, bs, head_to_chan)

    # (B, T, H) -> (B, H, 1, T). Small wrapper-side transpose (att is only ~H/C of the x
    # traffic); producing (B, H, T) in-kernel would need a minor-dim transpose of the tile.
    att = att_bth.transpose(0, 2, 1)[:, :, None, :]
    return y, att


def _reference(x, wk, bk, q, *, n_head, d_k):
    """Pure-JAX reference mirroring the PyTorch forward (eval mode), full f32 precision."""
    B, T, C = x.shape
    H, Dk, Dv = n_head, d_k, C // n_head
    hp = jax.lax.Precision.HIGHEST
    temperature = float(d_k) ** 0.5
    k = (jnp.dot(x.reshape(B * T, C), wk, precision=hp) + bk).reshape(B, T, H, Dk)
    k = k.transpose(0, 2, 1, 3)                                              # (B, H, T, Dk)
    att = jnp.einsum('hd,bhtd->bht', q, k, precision=hp)[:, :, None, :] / temperature
    att = jax.nn.softmax(att, axis=-1)                                       # (B, H, 1, T)
    v = x.reshape(B, T, H, Dv).transpose(0, 2, 1, 3)                         # (B, H, T, Dv)
    y = jnp.einsum('bhqt,bhtd->bhqd', att, v, precision=hp)                  # (B, H, 1, Dv)
    y = y.transpose(0, 2, 1, 3).reshape(B, C)
    return y, att


if __name__ == "__main__":
    # Small shapes consistent with the module; B=16 so the auto tile (tb=8) yields a 2-step
    # "parallel" grid with sublane-aligned (8, C) output blocks.
    B, T, C = 16, 8, 32
    n_head, d_k = 4, 8

    key = jax.random.PRNGKey(0)
    kx, kw, kb, kq = jax.random.split(key, 4)

    x = jax.random.normal(kx, (B, T, C), dtype=jnp.float32)
    # nn.Linear(d_in, n_head*d_k): deterministic synthetic init (scale ~ 1/sqrt(d_in))
    wk = jax.random.normal(kw, (C, n_head * d_k), dtype=jnp.float32) * (1.0 / C ** 0.5)
    bk = jax.random.normal(kb, (n_head * d_k,), dtype=jnp.float32) * 0.01
    # query parameter: normal(mean=0, std=sqrt(2/d_k)) like the PyTorch init
    q = jax.random.normal(kq, (n_head, d_k), dtype=jnp.float32) * (2.0 / d_k) ** 0.5

    y_ref, att_ref = _reference(x, wk, bk, q, n_head=n_head, d_k=d_k)

    # f32 path (module-exact semantics). The softmax reciprocal is exact now; the remaining
    # slack only covers MXU pass-precision differences between the kernel and the XLA reference.
    y, att = multi_head_attention(x, wk, bk, q, n_head=n_head, d_k=d_k)
    y, att = jax.block_until_ready(y), jax.block_until_ready(att)
    assert y.shape == (B, C) and att.shape == (B, n_head, 1, T)
    assert jnp.allclose(y, y_ref, atol=1e-2, rtol=1e-2), "f32 y mismatch"
    assert jnp.allclose(att, att_ref, atol=1e-2, rtol=1e-2), "f32 att mismatch"

    # bf16-fed path (halves the dominant x/weight DMA bytes; tolerance covers bf16 quantization
    # of x/ws -- accumulation, softmax and outputs stay f32).
    y16, att16 = multi_head_attention(x, wk, bk, q, n_head=n_head, d_k=d_k,
                                      compute_dtype=jnp.bfloat16)
    y16, att16 = jax.block_until_ready(y16), jax.block_until_ready(att16)
    assert jnp.allclose(y16, y_ref, atol=5e-2, rtol=5e-2), "bf16 y mismatch"
    assert jnp.allclose(att16, att_ref, atol=5e-2, rtol=5e-2), "bf16 att mismatch"

    print("KERNEL_OK")
</pallas_src>

<mosaic_0001>
module attributes {stable_mosaic.version = 11 : i64} {
  func.func @_mha_kernel(%arg0: i32, %arg1: memref<8x8x32xf32, #tpu.memory_space<vmem>>, %arg2: memref<32x4xf32, #tpu.memory_space<vmem>>, %arg3: memref<1x4xf32, #tpu.memory_space<vmem>>, %arg4: memref<4x32xf32, #tpu.memory_space<vmem>>, %arg5: memref<8x32xf32, #tpu.memory_space<vmem>>, %arg6: memref<8x8x4xf32, #tpu.memory_space<vmem>>) attributes {dimension_semantics = [#tpu.dimension_semantics<parallel>], iteration_bounds = array<i64: 2>, scalar_prefetch = 0 : i64, scratch_operands = 0 : i64, tpu.core_type = #tpu.core_type<tc>, window_params = [{transform_indices = @transform_0, window_bounds = array<i64: 8, 8, 32>}, {pipeline_mode = #tpu.pipeline_mode<synchronous>, transform_indices = @transform_1, window_bounds = array<i64: 32, 4>}, {pipeline_mode = #tpu.pipeline_mode<synchronous>, transform_indices = @transform_2, window_bounds = array<i64: 1, 4>}, {pipeline_mode = #tpu.pipeline_mode<synchronous>, transform_indices = @transform_3, window_bounds = array<i64: 4, 32>}, {transform_indices = @transform_4, window_bounds = array<i64: 8, 32>}, {transform_indices = @transform_5, window_bounds = array<i64: 8, 8, 4>}]} {
    %c0 = arith.constant 0 : index
    %c0_0 = arith.constant 0 : index
    %c0_1 = arith.constant 0 : index
    %0 = vector.load %arg1[%c0, %c0_0, %c0_1] : memref<8x8x32xf32, #tpu.memory_space<vmem>>, vector<8x8x32xf32>
    %1 = vector.shape_cast %0 : vector<8x8x32xf32> to vector<64x32xf32>
    %c0_2 = arith.constant 0 : index
    %c0_3 = arith.constant 0 : index
    %2 = vector.load %arg2[%c0_2, %c0_3] : memref<32x4xf32, #tpu.memory_space<vmem>>, vector<32x4xf32>
    %cst = arith.constant dense<0.000000e+00> : vector<64x4xf32>
    %3 = tpu.matmul %1, %2, %cst {dimension_numbers = #tpu.dot_dimension_numbers<[1], [0], [0], [1], [0, 0, 1, 1], [], []>} : vector<64x32xf32>, vector<32x4xf32>, vector<64x4xf32> -> vector<64x4xf32>
    %c0_4 = arith.constant 0 : index
    %c0_5 = arith.constant 0 : index
    %4 = vector.load %arg3[%c0_4, %c0_5] : memref<1x4xf32, #tpu.memory_space<vmem>>, vector<1x4xf32>
    %5 = vector.broadcast %4 : vector<1x4xf32> to vector<64x4xf32>
    %6 = arith.addf %3, %5 : vector<64x4xf32>
    %7 = vector.shape_cast %6 : vector<64x4xf32> to vector<8x8x4xf32>
    %cst_6 = arith.constant dense<0xFF800000> : vector<8x4xf32>
    %8 = vector.multi_reduction <maximumf>, %7, %cst_6 [1] : vector<8x8x4xf32> to vector<8x4xf32>
    %9 = vector.shape_cast %8 : vector<8x4xf32> to vector<8x1x4xf32>
    %10 = vector.broadcast %9 : vector<8x1x4xf32> to vector<8x8x4xf32>
    %11 = arith.subf %7, %10 : vector<8x8x4xf32>
    %12 = math.exp %11 : vector<8x8x4xf32>
    %cst_7 = arith.constant dense<0.000000e+00> : vector<8x4xf32>
    %13 = vector.multi_reduction <add>, %12, %cst_7 [1] : vector<8x8x4xf32> to vector<8x4xf32>
    %14 = vector.shape_cast %13 : vector<8x4xf32> to vector<8x1x4xf32>
    %15 = vector.broadcast %14 : vector<8x1x4xf32> to vector<8x8x4xf32>
    %16 = arith.divf %12, %15 : vector<8x8x4xf32>
    %c0_8 = arith.constant 0 : index
    %c0_9 = arith.constant 0 : index
    %c0_10 = arith.constant 0 : index
    %17 = vector.load %arg6[%c0_8, %c0_9, %c0_10] : memref<8x8x4xf32, #tpu.memory_space<vmem>>, vector<8x8x4xf32>
    tpu.vector_store %arg6[%c0_8, %c0_9, %c0_10], %16 {strides = array<i32>} : memref<8x8x4xf32, #tpu.memory_space<vmem>>, vector<8x8x4xf32>,
    %18 = vector.shape_cast %16 : vector<8x8x4xf32> to vector<64x4xf32>
    %c0_11 = arith.constant 0 : index
    %c0_12 = arith.constant 0 : index
    %19 = vector.load %arg4[%c0_11, %c0_12] : memref<4x32xf32, #tpu.memory_space<vmem>>, vector<4x32xf32>
    %cst_13 = arith.constant dense<0.000000e+00> : vector<64x32xf32>
    %20 = tpu.matmul %18, %19, %cst_13 {dimension_numbers = #tpu.dot_dimension_numbers<[1], [0], [0], [1], [0, 0, 1, 1], [], []>} : vector<64x4xf32>, vector<4x32xf32>, vector<64x32xf32> -> vector<64x32xf32>
    %21 = arith.mulf %20, %1 : vector<64x32xf32>
    %22 = vector.shape_cast %21 : vector<64x32xf32> to vector<8x8x32xf32>
    %cst_14 = arith.constant dense<0.000000e+00> : vector<8x32xf32>
    %23 = vector.multi_reduction <add>, %22, %cst_14 [1] : vector<8x8x32xf32> to vector<8x32xf32>
    %c0_15 = arith.constant 0 : index
    %c0_16 = arith.constant 0 : index
    %24 = vector.load %arg5[%c0_15, %c0_16] : memref<8x32xf32, #tpu.memory_space<vmem>>, vector<8x32xf32>
    tpu.vector_store %arg5[%c0_15, %c0_16], %23 {strides = array<i32>} : memref<8x32xf32, #tpu.memory_space<vmem>>, vector<8x32xf32>,
    return
  }
  func.func @transform_0(%arg0: i32) -> (i32, i32, i32) {
    %c0_i32 = arith.constant 0 : i32
    %c0_i32_0 = arith.constant 0 : i32
    %c0_i32_1 = arith.constant 0 : i32
    return %arg0, %c0_i32, %c0_i32_0 : i32, i32, i32
  }
  func.func @transform_1(%arg0: i32) -> (i32, i32) {
    %c0_i32 = arith.constant 0 : i32
    %c0_i32_0 = arith.constant 0 : i32
    %c0_i32_1 = arith.constant 0 : i32
    return %c0_i32, %c0_i32_0 : i32, i32
  }
  func.func @transform_2(%arg0: i32) -> (i32, i32) {
    %c0_i32 = arith.constant 0 : i32
    %c0_i32_0 = arith.constant 0 : i32
    %c0_i32_1 = arith.constant 0 : i32
    return %c0_i32, %c0_i32_0 : i32, i32
  }
  func.func @transform_3(%arg0: i32) -> (i32, i32) {
    %c0_i32 = arith.constant 0 : i32
    %c0_i32_0 = arith.constant 0 : i32
    %c0_i32_1 = arith.constant 0 : i32
    return %c0_i32, %c0_i32_0 : i32, i32
  }
  func.func @transform_4(%arg0: i32) -> (i32, i32) {
    %c0_i32 = arith.constant 0 : i32
    %c0_i32_0 = arith.constant 0 : i32
    return %arg0, %c0_i32 : i32, i32
  }
  func.func @transform_5(%arg0: i32) -> (i32, i32, i32) {
    %c0_i32 = arith.constant 0 : i32
    %c0_i32_0 = arith.constant 0 : i32
    %c0_i32_1 = arith.constant 0 : i32
    return %arg0, %c0_i32, %c0_i32_0 : i32, i32, i32
  }
}

</mosaic_0001>

<bundles_post_ra>
// kernel: tpu_custom_call.1
= control target key start
LH: loop header
LB: loop body
LE: loop exit
PB: predicated region body
PF: predicated region fallthrough
CT: control target
= control target key end

     0   :  { %11 = vsyncpa [#allocation3], 0  ;;  %s1525_s0 = inlined_call_operand.hbm [shape: f32[16,8,32], index: 0, kind: input, shape index: {}]   ;;  %s1526_s1 = inlined_call_operand.vmem [shape: f32[32,4], index: 1, kind: input, shape index: {}]   ;;  %s1527_s2 = inlined_call_operand.vmem [shape: f32[1,4], index: 2, kind: input, shape index: {}]   ;;  %s1528_s3 = inlined_call_operand.vmem [shape: f32[4,32], index: 3, kind: input, shape index: {}]   ;;  %s1529_s4 = inlined_call_operand.hbm [shape: f32[16,32], index: 4, kind: output, shape index: {0}]   ;;  %s1530_s5 = inlined_call_operand.vmem [shape: f32[16,8,4], index: 5, kind: output, shape index: {1}]  }
   0x1   :  { %13 = vsyncpa [#allocation3 + $0x1], 0 }
   0x2   :  { %14 = vsyncpa [#allocation4], 0 }
   0x3   :  { %16 = vsyncpa [#allocation4 + $0x1], 0  ;;  %s1217_s18 = smov 0   ;;  %s1219_s19 = smov 0  }
   0x4   :  { %s1221_s20 = smov 0   ;;  %s1223_s21 = smov 0  }
   0x5 LB: > { %s1238_s22 = sadd.s32 4294967295, %s1181_s21   ;;  %s908_s23 = sadd.s32 4294967294, %s1181_s21   ;;  %s1181_s21 = sphi %s1223_s21, %s1544_s21   ;;  %s1177_s20 = sphi %s1221_s20, %s1543_s20   ;;  %s1173_s19 = sphi %s1219_s19, %s1542_s19   ;;  %s1169_s18 = sphi %s1217_s18, %s1541_s18  }
   0x6   : > { %s1242_s24 = sadd.s32 1, %s1181_s21   ;;  %s29_s25 = sadd.s32 1, %s1177_s20 }
   0x7   : > { %s26_s26 = ssub.s32 %s1181_s21, %s1242_s24  ;;  %p36_p0 = scmp.ne.s32.totalorder %s1177_s20, %s1173_s19 }
   0x8   : > { %p27_p1 = scmp.eq.s32.totalorder %s26_s26, 0  ;;  %p37_p2 = scmp.eq.s32.totalorder %s1181_s21, 0 }
   0x9   : > { %p42_p3 = scmp.ne.s32.totalorder %s1173_s19, %s1169_s18  ;;  %p43_p4 = scmp.eq.s32.totalorder %s1238_s22, 0 }
   0xa   : > { %s1254_s27 = scalar_select %p27_p1, %s1177_s20, %s29_s25  }
   0xb   : > { %p1256_p5 = por %p37_p2, %p36_p0  ;;  %p1260_p6 = por %p43_p4, %p42_p3 }
   0xc   : > { %p129_p7 = scmp.eq.s32.totalorder %s1238_s22, 1  ;;  %p135_p8 = scmp.eq.s32.totalorder %s908_s23, 1 }
   0xd   : > { %p1017_p10 = scmp.lt.s32.totalorder %s1181_s21, 2  ;;  %s190_s7 = sand.u32 1, %s1177_s20  }
   0xe   : > { %p1267_p11 = por %p129_p7, %p36_p0  ;;  %p1271_p12 = por %p135_p8, %p42_p3 }
   0xf   : > { %s941_s8 = sshll.u32 %s1181_s21, 10  ;;  %s911_s9 = sshll.u32 %s190_s7, 6 }
  0x10   : > { %s1534_s30 = scalar_select %p1267_p11, 1, 0 }
  0x11   : > { %s1535_s6 = scalar_select %p1271_p12, 1, 0 }
  0x12   : > { %s1280_s12 = scalar_lea.hbm %s1525_s0, %s941_s8  ;;  %s194_s13 = scalar_lea.vmem [#allocation2], %s911_s9 }
  0x13   : > { %s201_s14 = sshll.u32 %s194_s13, 4  ;;  %p1284_p13 = pnand %p1017_p10, %p1256_p5  ;;  %s1288_s14 = int_to_ptr.vmem [resolvable:$true] %s201_s14 }
  0x14   : > { %s1290_s16 = scalar_lea.sflag [#allocation3], %s190_s7  ;;  %s1085_s17 = scalar_lea.hbm %s1280_s12, 1024 }
  0x15   : > { %p1086_p0 = scmp.ne.s32.totalorder %s1280_s12, %s1085_s17  ;;  %p1087_p1 = pneg %p1284_p13 }
  0x16   : > { %s1090_s26 = scalar_lea.hbm %s1525_s0, 2048  ;;  %p1091_p4 = scmp.lt.u32.totalorder %s1280_s12, %s1525_s0 }
  0x17   : > { %p1088_p2 = pnand %p1087_p1, %p1086_p0  ;;  %p1092_p5 = scmp.lt.u32.totalorder %s1090_s26, %s1085_s17 }
  0x18   : > { %p1094_p8 = scmp.lt.u32.totalorder %s1085_s17, %s1280_s12 }
  0x19   : > { %p1089_p3 = pneg %p1088_p2  ;;  %p1093_p7 = por %p1092_p5, %p1091_p4 }
  0x1b   : > { %p1095_p10 = por %p1094_p8, %p1093_p7 }
  0x1d   : > { %p1096_p9 = pnand %p1095_p10, %p1089_p3 }
  0x1f   : > { %1099 = shalt.err (!%p1096_p9)
}
  0x20   : > { %s1100_s7 = scalar_lea.vmem %s1288_s14, 1024  ;;  %s1183_s9 = smov [#allocation2]  }
  0x21   : > { %p1101_p0 = scmp.ne.s32.totalorder %s1288_s14, %s1100_s7  ;;  %s1105_s10 = sshll.u32 %s1183_s9, 4  ;;  %s1106_s10 = int_to_ptr.vmem [resolvable:$false] %s1105_s10 }
  0x22   : > { %s1107_s11 = scalar_lea.vmem %s1106_s10, 2048  ;;  %p1108_p11 = scmp.lt.s32.totalorder %s1288_s14, %s1106_s10 }
  0x23   : > { %p1103_p2 = pnand %p1101_p0, %p1087_p1  ;;  %p1109_p4 = scmp.lt.s32.totalorder %s1107_s11, %s1100_s7 }
  0x25   : > { %p1104_p12 = pneg %p1103_p2  ;;  %p1110_p5 = por %p1109_p4, %p1108_p11 }
  0x27   : > { %p1111_p7 = pnand %p1110_p5, %p1104_p12 }
  0x29   : > { %1114 = shalt.err (!%p1111_p7)
}
  0x2a   : > { %s1184_s13 = smov 128   ;;  %s1185_s17 = smov 8  }
  0x2b   : > { %1012 = dma.hbm_to_vmem [thread:$0]  (!%p1284_p13), %s1280_s12, 1024, %s1288_s14, %s1290_s16, %s1184_s13, %s1184_s13, %s1185_s17  }
  0x2c   : > { %p914_p9 = scmp.ge.s32.totalorder %s1181_s21, 1  ;;  %p209_p1 = scmp.lt.s32.totalorder %s1181_s21, 3 }
  0x2e   : > { %p210_p3 = pnand %p914_p9, %p209_p1 }
  0x2f   : > { %s1321_s23 = sand.u32 (!%p210_p3), 1, %s1173_s19  }
  0x30   : > { %213 = sbr.rel (%p210_p3) target bundleno = 595 (0x253), region = 36  ;;  %s915_s25 = sshll.u32 (!%p210_p3), %s1321_s23, 6 }
  0x31   : > { %s216_s26 = scalar_lea.sflag (!%p210_p3), [#allocation3], %s1321_s23  ;;  %s219_s28 = scalar_lea.vmem (!%p210_p3), [#allocation2], %s915_s25 }
  0x37   : > { %1160 = dma.done.wait (%p1260_p6), %s216_s26, 1024  }
  0x38   : > { %1162 = vsyncadd (%p1260_p6), %s216_s26, 4294966272  ;;  %vm277_vm0 = vcmask 261120   ;;  %v266_v0 = vld [vmem:[%s1526_s1] sm:$0xff]  ;;  %v267_v1 = vld [vmem:[%s1526_s1 + $0x8] sm:$0xff]  ;;  %vm593_vm1 = vcmask 1043456   ;;  %vm407_vm2 = vcmask 31744  }
  0x39   : > { %v268_v2 = vld [vmem:[%s1526_s1 + $0x10] sm:$0xff]  ;;  %v997_v3 = vpack.c.bf16 %v267_v1, %v266_v0  ;;  %v269_v4 = vld [vmem:[%s1526_s1 + $0x18] sm:$0xff]  ;;  %v1341_v5 = vld [vmem:[%s219_s28] sm:$0xff]  ;;  %s917_s25 = sshll.u32 %s1238_s22, 3  ;;  %vm774_vm3 = vcmask 1041409   ;;  %vm776_vm4 = vcmask 1042434  }
  0x3a   : > { %v1001_v6 = vpack.c.bf16 %v269_v4, %v268_v2  ;;  %971 = vmatprep.mubr.msk.f32.mxu0 %vm277_vm0, %v1341_v5  ;;  %v1345_v7 = vld [vmem:[%s219_s28 + $0x8] sm:$0xff]  ;;  %v1347_v8 = vld [vmem:[%s219_s28 + $0x10] sm:$0xff]  ;;  %v1353_v9 = vld [vmem:[%s219_s28 + $0x18] sm:$0xff]  ;;  %p1416_p6 = scmp.lt.s32.totalorder %s917_s25, 15  ;;  %vm778_vm5 = vcmask 1043459   ;;  %vm780_vm6 = vcmask 1044484  }
  0x3b   : > { %998 = vmatprep.subr.bf16.mxu0 %v997_v3  ;;  %v1355_v10 = vld [vmem:[%s219_s28 + $0x20] sm:$0xff]  ;;  %v1361_v11 = vld [vmem:[%s219_s28 + $0x28] sm:$0xff]  ;;  %v1363_v12 = vld [vmem:[%s219_s28 + $0x30] sm:$0xff]  ;;  %s916_s16 = sshll.u32 %s1321_s23, 3  ;;  %vm782_vm7 = vcmask 1045509   ;;  %vm784_vm8 = vcmask 1046534  }
  0x3c   : > { %1000 = vmatpush3.bf16.msra.mxu0 %v997_v3  ;;  %v1369_v13 = vld [vmem:[%s219_s28 + $0x38] sm:$0xff]  ;;  %v568_v14 = vld [vmem:[%s1528_s3] sm:$0xf]  ;;  %s1546_s25 = smov (!%p1416_p6, %s917_s25), 15  ;;  %s938_s8 = sshll.u32 %s1238_s22, 7  ;;  %vm786_vm9 = vcmask 1047559  }
  0x3d   : > { %1002 = vmatprep.subr.bf16.mxu0 %v1001_v6  ;;  %983 = vmatprep.subr.msk.mxu1 %vm593_vm1, %v568_v14  ;;  %v919_v15 = vld [vmem:[%s1527_s2] ss:$0 sm:$0xff]  ;;  %s918_s28 = sshll.u32 %s1546_s25, 3  ;;  %s243_s7 = scalar_lea.vmem [#allocation5], %s916_s16 }
  0x3e   : > { %984 = vmatpush3.msk.msra.mxu1 %vm593_vm1, %v568_v14  ;;  %s1426_s15 = scalar_lea.vmem %s1530_s5, %s918_s28  ;;  %s809_s9 = sshll.u32 %s243_s7, 4  ;;  %s1482_s9 = int_to_ptr.vmem [resolvable:$true] %s809_s9 }
  0x3f   : > { %s1480_s11 = scalar_lea.hbm %s1529_s4, %s938_s8  ;;  %s791_s22 = scalar_lea.sflag [#allocation4], %s1321_s23 }
  0x40   : > { %1004 = vmatpush3.bf16.msra.mxu0 %v1001_v6  ;;  %s1115_s13 = scalar_lea.vmem %s1482_s9, 128  ;;  %p1538_p12 = scmp.ne.s32.totalorder %s1534_s30, 0 }
  0x41   : > { %p1116_p11 = scmp.ne.s32.totalorder %s1482_s9, %s1115_s13  ;;  %s1186_s17 = smov [#allocation5]  }
  0x42   : > { %s1119_s25 = sshll.u32 %s1186_s17, 4  ;;  %s1120_s25 = int_to_ptr.vmem [resolvable:$false] %s1119_s25 }
  0x43   : > { %972 = vmatmul.mubr.msk.f32.vlgmr.msra.gmra.mrb[0].mxu0 %vm277_vm0, %v1345_v7  ;;  %p1117_p13 = pnand %p1116_p11, %p1538_p12  ;;  %s1121_s26 = scalar_lea.vmem %s1120_s25, 256 }
  0x44   : > { %974 = vmatprep.mubr.msk.f32.mxu0 %vm277_vm0, %v1347_v8  ;;  %p1122_p10 = scmp.lt.s32.totalorder %s1482_s9, %s1120_s25  ;;  %p1123_p0 = scmp.lt.s32.totalorder %s1121_s26, %s1115_s13 }
  0x45   : > { %p1118_p8 = pneg %p1117_p13 }
  0x46   : > { %p1124_p2 = por %p1123_p0, %p1122_p10 }
  0x47   : > { %975 = vmatmul.mubr.msk.f32.gmra.mrb[2].mxu0 %vm277_vm0, %v1353_v9 }
  0x48   : > { %977 = vmatprep.mubr.msk.f32.mxu0 %vm277_vm0, %v1355_v10  ;;  %p1125_p4 = pnand %p1124_p2, %p1118_p8 }
  0x4b   : > { %978 = vmatmul.mubr.msk.f32.gmra.mrb[4].mxu0 %vm277_vm0, %v1361_v11 }
  0x4c   : > { %980 = vmatprep.mubr.msk.f32.mxu0 %vm277_vm0, %v1363_v12 }
  0x4f   : > { %981 = vmatmul.mubr.msk.f32.gmra.mrb[6].mxu0 %vm277_vm0, %v1369_v13 }
 0x116   : > { %v973_v16 = vpop.f32.mrb[0].mxu0 }
 0x117   : > { %v374_v17 = vadd.f32 %v973_v16, %v919_v15  ;;  %v368_v18 = vpop.f32.mrb[1].mxu0 }
 0x118   : > { %v369_v19 = vadd.f32 %v919_v15, %v368_v18 }
 0x119   : > { %v415_v20 = vsel %vm407_vm2, %v374_v17, -inf }
 0x11a   : > { %v416_v21 = vrot.slane %v415_v20, 4  ;;  %v408_v22 = vsel %vm407_vm2, %v369_v19, -inf  ;;  %v976_v23 = vpop.f32.mrb[2].mxu0 }
 0x11b   : > { %v409_v24 = vrot.slane %v408_v22, 4  ;;  %v384_v25 = vadd.f32 %v976_v23, %v919_v15  ;;  %v378_v26 = vpop.f32.mrb[3].mxu0 }
 0x11c   : > { %v417_v27 = vmax.f32 %v415_v20, %v416_v21  ;;  %v379_v28 = vadd.f32 %v919_v15, %v378_v26 }
 0x11d   : > { %v410_v29 = vmax.f32 %v408_v22, %v409_v24  ;;  %v429_v30 = vsel %vm407_vm2, %v384_v25, -inf }
 0x11e   : > { %v418_v31 = vrot.slane %v417_v27, 2  ;;  %v430_v32 = vrot.slane %v429_v30, 4  ;;  %v422_v33 = vsel %vm407_vm2, %v379_v28, -inf  ;;  %v979_v34 = vpop.f32.mrb[4].mxu0 }
 0x11f   : > { %v411_v35 = vrot.slane %v410_v29, 2  ;;  %v423_v36 = vrot.slane %v422_v33, 4  ;;  %v394_v37 = vadd.f32 %v979_v34, %v919_v15  ;;  %v388_v38 = vpop.f32.mrb[5].mxu0 }
 0x120   : > { %v419_v39 = vmax.f32 %v417_v27, %v418_v31  ;;  %v431_v40 = vmax.f32 %v429_v30, %v430_v32  ;;  %v389_v41 = vadd.f32 %v919_v15, %v388_v38 }
 0x121   : > { %v412_v42 = vmax.f32 %v410_v29, %v411_v35  ;;  %v424_v43 = vmax.f32 %v422_v33, %v423_v36  ;;  %v443_v44 = vsel %vm407_vm2, %v394_v37, -inf }
 0x122   : > { %v420_v45 = vrot.slane %v419_v39, 1  ;;  %v432_v46 = vrot.slane %v431_v40, 2  ;;  %v444_v47 = vrot.slane %v443_v44, 4  ;;  %v436_v48 = vsel %vm407_vm2, %v389_v41, -inf  ;;  %v982_v49 = vpop.f32.mrb[6].mxu0 }
 0x123   : > { %v413_v50 = vrot.slane %v412_v42, 1  ;;  %v425_v51 = vrot.slane %v424_v43, 2  ;;  %v437_v52 = vrot.slane %v436_v48, 4  ;;  %v404_v53 = vadd.f32 %v982_v49, %v919_v15  ;;  %v398_v54 = vpop.f32.mrb[7].mxu0 }
 0x124   : > { %v421_v55 = vmax.f32 %v419_v39, %v420_v45  ;;  %v433_v56 = vmax.f32 %v431_v40, %v432_v46  ;;  %v445_v57 = vmax.f32 %v443_v44, %v444_v47  ;;  %v399_v58 = vadd.f32 %v919_v15, %v398_v54 }
 0x125   : > { %v414_v59 = vmax.f32 %v412_v42, %v413_v50  ;;  %v426_v60 = vmax.f32 %v424_v43, %v425_v51  ;;  %v438_v61 = vmax.f32 %v436_v48, %v437_v52  ;;  %v457_v62 = vsel %vm407_vm2, %v404_v53, -inf }
 0x126   : > { %v465_v63 = vsub.f32 %v374_v17, %v421_v55  ;;  %v434_v0 = vrot.slane %v433_v56, 1  ;;  %v446_v1 = vrot.slane %v445_v57, 2  ;;  %v458_v2 = vrot.slane %v457_v62, 4 }
 0x127   : > { %v464_v3 = vsub.f32 %v369_v19, %v414_v59  ;;  %v427_v4 = vrot.slane %v426_v60, 1  ;;  %v439_v6 = vrot.slane %v438_v61, 2  ;;  %v450_v14 = vsel %vm407_vm2, %v399_v58, -inf }
 0x128   : > { %v474_v16 = vmul.f32 1.442695, %v465_v63  ;;  %v435_v18 = vmax.f32 %v433_v56, %v434_v0  ;;  %v447_v20 = vmax.f32 %v445_v57, %v446_v1  ;;  %v459_v21 = vmax.f32 %v457_v62, %v458_v2 }
 0x129   : > { %v472_v22 = vmul.f32 1.442695, %v464_v3  ;;  %v428_v15 = vmax.f32 %v426_v60, %v427_v4  ;;  %v440_v23 = vmax.f32 %v438_v61, %v439_v6  ;;  %v451_v24 = vrot.slane %v450_v14, 4 }
 0x12a   : > { %1053 = vpow2.f32 %v474_v16  ;;  %v467_v26 = vsub.f32 %v384_v25, %v435_v18  ;;  %v448_v27 = vrot.slane %v447_v20, 1  ;;  %v460_v17 = vrot.slane %v459_v21, 2 }
 0x12b   : > { %1055 = vpow2.f32 %v472_v22  ;;  %v466_v29 = vsub.f32 %v379_v28, %v428_v15  ;;  %v441_v30 = vrot.slane %v440_v23, 1  ;;  %v452_v19 = vmax.f32 %v450_v14, %v451_v24 }
 0x12c   : > { %v478_v31 = vmul.f32 1.442695, %v467_v26  ;;  %v449_v32 = vmax.f32 %v447_v20, %v448_v27  ;;  %v461_v33 = vmax.f32 %v459_v21, %v460_v17 }
 0x12d   : > { %v476_v34 = vmul.f32 1.442695, %v466_v29  ;;  %v442_v35 = vmax.f32 %v440_v23, %v441_v30  ;;  %v453_v36 = vrot.slane %v452_v19, 2 }
 0x12e   : > { %1057 = vpow2.f32 %v478_v31  ;;  %v469_v38 = vsub.f32 %v394_v37, %v449_v32  ;;  %v462_v39 = vrot.slane %v461_v33, 1 }
 0x12f   : > { %1059 = vpow2.f32 %v476_v34  ;;  %v468_v40 = vsub.f32 %v389_v41, %v442_v35  ;;  %v454_v42 = vmax.f32 %v452_v19, %v453_v36 }
 0x130   : > { %v482_v43 = vmul.f32 1.442695, %v469_v38  ;;  %v463_v25 = vmax.f32 %v461_v33, %v462_v39 }
 0x131   : > { %v480_v44 = vmul.f32 1.442695, %v468_v40  ;;  %v455_v45 = vrot.slane %v454_v42, 1 }
 0x132   : > { %1061 = vpow2.f32 %v482_v43  ;;  %v471_v28 = vsub.f32 %v404_v53, %v463_v25 }
 0x133   : > { %1063 = vpow2.f32 %v480_v44  ;;  %v456_v46 = vmax.f32 %v454_v42, %v455_v45 }
 0x134   : > { %v1387_v47 = vpop.eup %1053  ;;  %v486_v48 = vmul.f32 1.442695, %v471_v28 }
 0x135   : > { %v1389_v49 = vpop.eup %1055  ;;  %v495_v37 = vsel %vm407_vm2, %v1387_v47, 0.0  ;;  %v470_v50 = vsub.f32 %v399_v58, %v456_v46 }
 0x136   : > { %v496_v51 = vrot.slane %v495_v37, 4  ;;  %v488_v41 = vsel %vm407_vm2, %v1389_v49, 0.0  ;;  %1065 = vpow2.f32 %v486_v48 }
 0x137   : > { %v489_v52 = vrot.slane %v488_v41, 4  ;;  %v484_v54 = vmul.f32 1.442695, %v470_v50 }
 0x138   : > { %v1395_v55 = vpop.eup %1057  ;;  %v497_v53 = vadd.f32 %v496_v51, %v495_v37 }
 0x139   : > { %v1397_v56 = vpop.eup %1059  ;;  %v490_v57 = vadd.f32 %v489_v52, %v488_v41  ;;  %v509_v59 = vsel %vm407_vm2, %v1395_v55, 0.0  ;;  %1067 = vpow2.f32 %v484_v54 }
 0x13a   : > { %v498_v60 = vrot.slane %v497_v53, 2  ;;  %v510_v58 = vrot.slane %v509_v59, 4  ;;  %v502_v61 = vsel %vm407_vm2, %v1397_v56, 0.0 }
 0x13b   : > { %v503_v62 = vrot.slane %v502_v61, 4  ;;  %v491_v63 = vrot.slane %v490_v57, 2 }
 0x13c   : > { %v1403_v0 = vpop.eup %1061  ;;  %v499_v1 = vadd.f32 %v498_v60, %v497_v53  ;;  %v511_v2 = vadd.f32 %v510_v58, %v509_v59 }
 0x13d   : > { %v1405_v3 = vpop.eup %1063  ;;  %v504_v4 = vadd.f32 %v503_v62, %v502_v61  ;;  %v523_v6 = vsel %vm407_vm2, %v1403_v0, 0.0  ;;  %v492_v14 = vadd.f32 %v491_v63, %v490_v57 }
 0x13e   : > { %v500_v16 = vrot.slane %v499_v1, 1  ;;  %v512_v18 = vrot.slane %v511_v2, 2  ;;  %v524_v20 = vrot.slane %v523_v6, 4  ;;  %v516_v21 = vsel %vm407_vm2, %v1405_v3, 0.0 }
 0x13f   : > { %v505_v22 = vrot.slane %v504_v4, 2  ;;  %v517_v15 = vrot.slane %v516_v21, 4  ;;  %v493_v23 = vrot.slane %v492_v14, 1 }
 0x140   : > { %v1412_v24 = vpop.eup %1065  ;;  %v513_v26 = vadd.f32 %v512_v18, %v511_v2  ;;  %v525_v27 = vadd.f32 %v524_v20, %v523_v6  ;;  %v501_v17 = vadd.f32 %v500_v16, %v499_v1 }
 0x141   : > { %v506_v29 = vadd.f32 %v505_v22, %v504_v4  ;;  %v518_v30 = vadd.f32 %v517_v15, %v516_v21  ;;  %v537_v19 = vsel %vm407_vm2, %v1412_v24, 0.0  ;;  %v494_v31 = vadd.f32 %v493_v23, %v492_v14 }
 0x142   : > { %v514_v32 = vrot.slane %v513_v26, 1  ;;  %v526_v33 = vrot.slane %v525_v27, 2  ;;  %v538_v34 = vrot.slane %v537_v19, 4  ;;  %1069 = vrcp.f32 %v501_v17 }
 0x143   : > { %v1068_v35 = vpop.eup %1067  ;;  %v507_v36 = vrot.slane %v506_v29, 1  ;;  %v519_v38 = vrot.slane %v518_v30, 2  ;;  %1071 = vrcp.f32 %v494_v31 }
 0x144   : > { %v527_v39 = vadd.f32 %v526_v33, %v525_v27  ;;  %v539_v40 = vadd.f32 %v538_v34, %v537_v19  ;;  %v530_v42 = vsel %vm407_vm2, %v1068_v35, 0.0  ;;  %v515_v43 = vadd.f32 %v514_v32, %v513_v26 }
 0x145   : > { %v520_v25 = vadd.f32 %v519_v38, %v518_v30  ;;  %v531_v44 = vrot.slane %v530_v42, 4  ;;  %v508_v45 = vadd.f32 %v507_v36, %v506_v29 }
 0x146   : > { %v528_v28 = vrot.slane %v527_v39, 1  ;;  %v540_v46 = vrot.slane %v539_v40, 2  ;;  %1073 = vrcp.f32 %v515_v43 }
 0x147   : > { %v521_v48 = vrot.slane %v520_v25, 1  ;;  %v532_v37 = vadd.f32 %v531_v44, %v530_v42  ;;  %1075 = vrcp.f32 %v508_v45 }
 0x148   : > { %v541_v50 = vadd.f32 %v540_v46, %v539_v40  ;;  %v529_v51 = vadd.f32 %v528_v28, %v527_v39 }
 0x149   : > { %v533_v41 = vrot.slane %v532_v37, 2  ;;  %v522_v52 = vadd.f32 %v521_v48, %v520_v25 }
 0x14a   : > { %v542_v54 = vrot.slane %v541_v50, 1  ;;  %1077 = vrcp.f32 %v529_v51 }
 0x14b   : > { %v534_v53 = vadd.f32 %v533_v41, %v532_v37  ;;  %1079 = vrcp.f32 %v522_v52 }
 0x14c   : > { %v1070_v57 = vpop.eup %1069  ;;  %v543_v59 = vadd.f32 %v542_v54, %v541_v50 }
 0x14d   : > { %v1072_v60 = vpop.eup %1071  ;;  %v535_v58 = vrot.slane %v534_v53, 1  ;;  %v547_v61 = vmul.f32 %v1070_v57, %v1387_v47 }
 0x14e   : > { %v545_v62 = vmul.f32 %v1072_v60, %v1389_v49  ;;  %1081 = vrcp.f32 %v543_v59 }
 0x14f   : > { %561 = vst.msk [vmem:[%s1426_s15 + $0x8] sm:$0xff] %vm407_vm2, %v547_v61  ;;  %v536_v63 = vadd.f32 %v535_v58, %v534_v53 }
 0x150   : > { %v1074_v1 = vpop.eup %1073  ;;  %560 = vst.msk [vmem:[%s1426_s15] sm:$0xff] %vm407_vm2, %v545_v62  ;;  %985 = vmatprep.mubr.msk.f32.mxu1 %vm407_vm2, %v545_v62 }
 0x151   : > { %v1076_v2 = vpop.eup %1075  ;;  %986 = vmatmul.mubr.msk.f32.vlgmr.msra.gmra.mrb[0].mxu1 %vm407_vm2, %v547_v61  ;;  %v551_v4 = vmul.f32 %v1074_v1, %v1395_v55  ;;  %1083 = vrcp.f32 %v536_v63 }
 0x152   : > { %v549_v47 = vmul.f32 %v1076_v2, %v1397_v56 }
 0x153   : > { %563 = vst.msk [vmem:[%s1426_s15 + $0x18] sm:$0xff] %vm407_vm2, %v551_v4 }
 0x154   : > { %v1078_v49 = vpop.eup %1077  ;;  %562 = vst.msk [vmem:[%s1426_s15 + $0x10] sm:$0xff] %vm407_vm2, %v549_v47  ;;  %988 = vmatprep.mubr.msk.f32.mxu1 %vm407_vm2, %v549_v47 }
 0x155   : > { %v1080_v6 = vpop.eup %1079  ;;  %989 = vmatmul.mubr.msk.f32.gmra.mrb[2].mxu1 %vm407_vm2, %v551_v4  ;;  %v555_v14 = vmul.f32 %v1078_v49, %v1403_v0 }
 0x156   : > { %v553_v16 = vmul.f32 %v1080_v6, %v1405_v3 }
 0x157   : > { %565 = vst.msk [vmem:[%s1426_s15 + $0x28] sm:$0xff] %vm407_vm2, %v555_v14 }
 0x158   : > { %v1082_v55 = vpop.eup %1081  ;;  %564 = vst.msk [vmem:[%s1426_s15 + $0x20] sm:$0xff] %vm407_vm2, %v553_v16  ;;  %991 = vmatprep.mubr.msk.f32.mxu1 %vm407_vm2, %v553_v16 }
 0x159   : > { %992 = vmatmul.mubr.msk.f32.gmra.mrb[4].mxu1 %vm407_vm2, %v555_v14  ;;  %v559_v56 = vmul.f32 %v1082_v55, %v1412_v24 }
 0x15b   : > { %v1084_v18 = vpop.eup %1083  ;;  %567 = vst.msk [vmem:[%s1426_s15 + $0x38] sm:$0xff] %vm407_vm2, %v559_v56 }
 0x15c   : > { %v557_v20 = vmul.f32 %v1084_v18, %v1068_v35 }
 0x15e   : > { %566 = vst.msk [vmem:[%s1426_s15 + $0x30] sm:$0xff] %vm407_vm2, %v557_v20  ;;  %994 = vmatprep.mubr.msk.f32.mxu1 %vm407_vm2, %v557_v20 }
 0x15f   : > { %995 = vmatmul.mubr.msk.f32.gmra.mrb[6].mxu1 %vm407_vm2, %v559_v56 }
 0x224   : > { %v987_v0 = vpop.f32.mrb[0].mxu1 }
 0x225   : > { %v703_v3 = vmul.f32 %v987_v0, %v1345_v7  ;;  %v663_v21 = vpop.f32.mrb[1].mxu1 }
 0x226   : > { %v702_v22 = vmul.f32 %v663_v21, %v1341_v5 }
 0x227   : > { %v717_v15 = vsel %vm277_vm0, %v703_v3, 0.0 }
 0x228   : > { %v718_v23 = vrot.slane %v717_v15, 4  ;;  %v710_v24 = vsel %vm277_vm0, %v702_v22, 0.0  ;;  %v990_v26 = vpop.f32.mrb[2].mxu1 }
 0x229   : > { %v711_v27 = vrot.slane %v710_v24, 4  ;;  %v705_v17 = vmul.f32 %v990_v26, %v1353_v9  ;;  %v673_v29 = vpop.f32.mrb[3].mxu1 }
 0x22a   : > { %v719_v30 = vadd.f32 %v718_v23, %v717_v15  ;;  %v704_v19 = vmul.f32 %v673_v29, %v1347_v8 }
 0x22b   : > { %v712_v31 = vadd.f32 %v711_v27, %v710_v24  ;;  %v731_v32 = vsel %vm277_vm0, %v705_v17, 0.0 }
 0x22c   : > { %v720_v7 = vrot.slane %v719_v30, 2  ;;  %v732_v33 = vrot.slane %v731_v32, 4  ;;  %v724_v5 = vsel %vm277_vm0, %v704_v19, 0.0  ;;  %v993_v34 = vpop.f32.mrb[4].mxu1 }
 0x22d   : > { %v713_v35 = vrot.slane %v712_v31, 2  ;;  %v725_v36 = vrot.slane %v724_v5, 4  ;;  %v707_v38 = vmul.f32 %v993_v34, %v1361_v11  ;;  %v683_v39 = vpop.f32.mrb[5].mxu1 }
 0x22e   : > { %v721_v40 = vadd.f32 %v720_v7, %v719_v30  ;;  %v733_v42 = vadd.f32 %v732_v33, %v731_v32  ;;  %v706_v9 = vmul.f32 %v683_v39, %v1355_v10 }
 0x22f   : > { %v714_v43 = vadd.f32 %v713_v35, %v712_v31  ;;  %v726_v25 = vadd.f32 %v725_v36, %v724_v5  ;;  %v745_v8 = vsel %vm277_vm0, %v707_v38, 0.0 }
 0x230   : > { %v722_v44 = vrot.slane %v721_v40, 1  ;;  %v734_v45 = vrot.slane %v733_v42, 2  ;;  %v746_v28 = vrot.slane %v745_v8, 4  ;;  %v738_v46 = vsel %vm277_vm0, %v706_v9, 0.0 }
 0x231   : > { %v715_v48 = vrot.slane %v714_v43, 1  ;;  %v727_v37 = vrot.slane %v726_v25, 2  ;;  %v739_v50 = vrot.slane %v738_v46, 4 }
 0x232   : > { %v723_v51 = vadd.f32 %v722_v44, %v721_v40  ;;  %v735_v11 = vadd.f32 %v734_v45, %v733_v42  ;;  %v747_v41 = vadd.f32 %v746_v28, %v745_v8  ;;  %v996_v52 = vpop.f32.mrb[6].mxu1 }
 0x233   : > { %v716_v54 = vadd.f32 %v715_v48, %v714_v43  ;;  %v728_v53 = vadd.f32 %v727_v37, %v726_v25  ;;  %v740_v10 = vadd.f32 %v739_v50, %v738_v46  ;;  %v709_v57 = vmul.f32 %v996_v52, %v1369_v13  ;;  %v693_v59 = vpop.f32.mrb[7].mxu1 }
 0x234   : > { %v736_v60 = vrot.slane %v735_v11, 1  ;;  %v748_v58 = vrot.slane %v747_v41, 2  ;;  %v708_v61 = vmul.f32 %v693_v59, %v1363_v12 }
 0x235   : > { %v775_v62 = vsel %vm774_vm3, %v723_v51, %v716_v54  ;;  %v729_v63 = vrot.slane %v728_v53, 1  ;;  %v741_v1 = vrot.slane %v740_v10, 2  ;;  %v759_v2 = vsel %vm277_vm0, %v709_v57, 0.0 }
 0x236   : > { %v749_v4 = vadd.f32 %v748_v58, %v747_v41  ;;  %v760_v47 = vrot.slane %v759_v2, 4  ;;  %v752_v49 = vsel %vm277_vm0, %v708_v61, 0.0  ;;  %v737_v16 = vadd.f32 %v736_v60, %v735_v11 }
 0x237   : > { %v730_v6 = vadd.f32 %v729_v63, %v728_v53  ;;  %v742_v14 = vadd.f32 %v741_v1, %v740_v10  ;;  %v753_v13 = vrot.slane %v752_v49, 4 }
 0x238   : > { %v750_v55 = vrot.slane %v749_v4, 1  ;;  %v761_v56 = vadd.f32 %v760_v47, %v759_v2 }
 0x239   : > { %v777_v18 = vsel %vm776_vm4, %v730_v6, %v775_v62  ;;  %v743_v12 = vrot.slane %v742_v14, 1  ;;  %v754_v20 = vadd.f32 %v753_v13, %v752_v49 }
 0x23a   : > { %v779_v0 = vsel %vm778_vm5, %v737_v16, %v777_v18  ;;  %v762_v3 = vrot.slane %v761_v56, 2  ;;  %v751_v15 = vadd.f32 %v750_v55, %v749_v4 }
 0x23b   : > { %v744_v21 = vadd.f32 %v743_v12, %v742_v14  ;;  %v755_v22 = vrot.slane %v754_v20, 2 }
 0x23c   : > { %v763_v23 = vadd.f32 %v762_v3, %v761_v56 }
 0x23d   : > { %v781_v24 = vsel %vm780_vm6, %v744_v21, %v779_v0  ;;  %v756_v26 = vadd.f32 %v755_v22, %v754_v20 }
 0x23e   : > { %v764_v27 = vrot.slane %v763_v23, 1  ;;  %v783_v17 = vsel %vm782_vm7, %v751_v15, %v781_v24 }
 0x23f   : > { %v757_v29 = vrot.slane %v756_v26, 1 }
 0x240   : > { %v765_v19 = vadd.f32 %v764_v27, %v763_v23 }
 0x241   : > { %v758_v30 = vadd.f32 %v757_v29, %v756_v26 }
 0x243   : > { %v785_v31 = vsel %vm784_vm8, %v758_v30, %v783_v17 }
 0x244   : > { %v787_v32 = vsel %vm786_vm9, %v765_v19, %v785_v31 }
 0x245   : > { %789 = vst.msk [vmem:[%s243_s7] sm:$0xff] %vm277_vm0, %v787_v32 }
 0x246   : > { %1128 = shalt.err (!%p1125_p4)
}
 0x247   : > { %s1129_s23 = scalar_lea.hbm %s1480_s11, 128  ;;  %s1133_s14 = scalar_lea.hbm %s1529_s4, 256 }
 0x248   : > { %p1130_p5 = scmp.ne.s32.totalorder %s1480_s11, %s1129_s23  ;;  %p1134_p1 = scmp.lt.u32.totalorder %s1480_s11, %s1529_s4 }
 0x249   : > { %p1135_p3 = scmp.lt.u32.totalorder %s1133_s14, %s1129_s23  ;;  %p1137_p11 = scmp.lt.u32.totalorder %s1129_s23, %s1480_s11 }
 0x24a   : > { %p1131_p7 = pnand %p1130_p5, %p1538_p12 }
 0x24b   : > { %p1136_p6 = por %p1135_p3, %p1134_p1 }
 0x24c   : > { %p1132_p9 = pneg %p1131_p7 }
 0x24d   : > { %p1138_p13 = por %p1137_p11, %p1136_p6 }
 0x24f   : > { %p1139_p8 = pnand %p1138_p13, %p1132_p9 }
 0x251   : > { %1142 = shalt.err (!%p1139_p8)
}
 0x252   : > { %1007 = dma.vmem_to_hbm [thread:$0]  (%p1538_p12), %s1482_s9, 128, %s1480_s11, %s791_s22  }
 0x253 PF: > { %s825_s8 = sand.u32 1, %s1169_s18   ;;  %p1539_p10 = scmp.ne.s32.totalorder %s1535_s6, 0 }
 0x254   : > { %p1540_p0 = scmp.ge.s32.totalorder %s1181_s21, 2  ;;  %s826_s7 = scalar_lea.sflag [#allocation4], %s825_s8 }
 0x256   : > { %p1014_p2 = pnand %p1540_p0, %p1539_p10 }
 0x258   : > { %1164 = dma.done.wait (!%p1014_p2), %s826_s7, 128  }
 0x259   : > { %1166 = vsyncadd (!%p1014_p2), %s826_s7, 4294967168  ;;  %p19_p4 = scmp.ge.s32.totalorder %s1242_s24, 4   ;;  %s1541_s18 = smov %s1173_s19 }
 0x25a   : > { %s1542_s19 = smov %s1177_s20  ;;  %s1543_s20 = smov %s1254_s27 }
 0x25b   : > { %s1544_s21 = smov %s1242_s24  ;;  %21 = sbr.rel (!%p19_p4) target bundleno = 5 (0x5), region = 93 }
 0x262   :  { %839 = vsyncpa [#allocation3], 1 }
 0x263   :  { %841 = vsyncpa [#allocation3 + $0x1], 1 }
 0x264   :  { %842 = vsyncpa [#allocation4], 1 }
 0x265   :  { %844 = vsyncpa [#allocation4 + $0x1], 1 }

</bundles_post_ra>
